<compile_context>
chip_gen: v7x
topology: tpu7x:2x2x1
jax: 0.10.0
libtpu: 0.0.40
codegen_flags: <defaults>
</compile_context>

<pallas_src>
import jax
import jax.numpy as jnp
from jax.experimental import pallas as pl
from jax.experimental.pallas import tpu as pltpu

_H1, _H2 = 32, 16          # hidden widths of the Output MLP
_H1P = 40                  # 32 hidden units + 1 ones-carrier row, padded to sublane x8
_H2P = 24                  # 16 hidden units + 1 ones-carrier row, padded to sublane x8
_SLAB_ROWS = _H1P + _H2P + _H2P   # 40 + 24 + 24 = 88 (all section starts are x8 aligned)


def _round_up(x, m):
    return (x + m - 1) // m * m


def _make_output_mlp_kernel(kp):
    """Kernel closed over the (static) padded input-feature length kp."""

    def kernel(x_ref, wp_ref, o_ref):
        # x_ref : (kp, T_tile)  — batch rows on lanes, features on sublanes
        # wp_ref: (88, C) packed slab:
        #   rows [ 0,40) : W1_aug = [W1 | b1 | ones-generator], shape (40, kp) used
        #   rows [40,64) : W2_aug = [W2 | b2 | ones-generator], shape (24, 40) used
        #   rows [64,88) : [w3 ; b3 ; 0] as a (24, 1) column
        x = x_ref[...]                                               # (kp, TT)
        w1a = wp_ref[0:_H1P, 0:kp]                                   # (40, kp)
        w2a = wp_ref[_H1P:_H1P + _H2P, 0:_H1P]                       # (24, 40)
        w3c = wp_ref[_H1P + _H2P:_SLAB_ROWS, 0:1]                    # (24, 1)

        h1 = jnp.maximum(
            jnp.dot(w1a, x, preferred_element_type=jnp.float32), 0.0)    # (40, TT)
        h2 = jnp.maximum(
            jnp.dot(w2a, h1, preferred_element_type=jnp.float32), 0.0)   # (24, TT)
        # last layer on VPU (mul) + XLU (sublane reduce) instead of a third MXU pass
        z = jnp.sum(h2 * w3c, axis=0, keepdims=True)                     # (1, TT)
        o_ref[...] = jax.nn.sigmoid(z)                                   # EUP

    return kernel


def pack_output_params(params, k_eff):
    """Pack (w1,b1,w2,b2,w3,b3) — nn.Linear (out_features, in_features) layout — into
    one f32 slab.  Call ONCE at model init; returns (slab, kp).

    w1 is sliced to its first k_eff input columns (the zero tail of the torch `tapes`
    buffer contributes nothing).  Biases are folded in via an augmented constant-1
    input lane that is carried through both hidden layers by unit 'ones-generator'
    rows, so the kernel needs no separate bias adds.
    """
    w1, b1, w2, b2, w3, b3 = [jnp.asarray(p, jnp.float32) for p in params]
    kp = _round_up(k_eff + 1, 8)          # +1 for the constant-1 lane
    cols = max(kp, _H1P)                  # slab lane width (full-array dim, x8 aligned)

    w1a = jnp.zeros((_H1P, cols), jnp.float32)
    w1a = w1a.at[0:_H1, 0:k_eff].set(w1[:, 0:k_eff])
    w1a = w1a.at[0:_H1, k_eff].set(b1.reshape(-1))
    w1a = w1a.at[_H1, k_eff].set(1.0)     # row 32 reproduces the constant 1

    w2a = jnp.zeros((_H2P, cols), jnp.float32)
    w2a = w2a.at[0:_H2, 0:_H1].set(w2)
    w2a = w2a.at[0:_H2, _H1].set(b2.reshape(-1))
    w2a = w2a.at[_H2, _H1].set(1.0)       # row 16 reproduces the constant 1

    w3a = jnp.zeros((_H2P, cols), jnp.float32)
    w3a = w3a.at[0:_H2, 0].set(w3.reshape(-1))
    w3a = w3a.at[_H2, 0].set(b3.reshape(-1)[0])

    return jnp.concatenate([w1a, w2a, w3a], axis=0), kp


def output_forward_batch(rows, packed, kp, *, t_tile=None):
    """Evaluate T independent Output.forward() inputs in one pallas_call.

    rows  : (T, k_eff) f32 — each row is concat([c_hid.reshape(-1), t_tapes]).
    packed: slab from pack_output_params (built once, outside the step loop).
    Returns (T, 1) f32.
    """
    T, k_eff = rows.shape
    assert kp == _round_up(k_eff + 1, 8), "slab was packed for a different k_eff"
    if t_tile is None:
        t_tile = 512 if T >= 512 else 128     # amortize ~0.35us per grid step
    t_pad = _round_up(T, t_tile)

    # augmented input: append the constant-1 lane that carries the biases, pad, transpose
    ones = jnp.ones((T, 1), jnp.float32)
    x = jnp.concatenate([rows.astype(jnp.float32), ones], axis=1)        # (T, k_eff+1)
    x = jnp.pad(x, ((0, t_pad - T), (0, kp - (k_eff + 1))))
    xt = x.T                                                             # (kp, t_pad)

    cost = pl.CostEstimate(
        flops=2 * t_pad * (kp * _H1P + _H1P * _H2P + _H2P),
        transcendentals=t_pad,
        bytes_accessed=4 * (kp * t_pad + packed.size + t_pad),
    )
    out = pl.pallas_call(
        _make_output_mlp_kernel(kp),
        out_shape=jax.ShapeDtypeStruct((1, t_pad), jnp.float32),
        grid_spec=pltpu.PrefetchScalarGridSpec(
            num_scalar_prefetch=0,
            grid=(t_pad // t_tile,),
            in_specs=[
                pl.BlockSpec((kp, t_tile), lambda i: (0, i)),
                pl.BlockSpec(packed.shape, lambda i: (0, 0)),   # constant -> fetched once
            ],
            out_specs=pl.BlockSpec((1, t_tile), lambda i: (0, i)),
        ),
        compiler_params=pltpu.CompilerParams(dimension_semantics=("parallel",)),
        cost_estimate=cost,
    )(xt, packed)
    return out[0, :T].reshape(T, 1)


def output_forward(c_hid, mem_tapes, packed, kp, tape_out_size):
    """Exact Output.forward() semantics for a single call. Returns shape (1,)."""
    t_tapes = jnp.concatenate([t.reshape(-1) for t in mem_tapes])
    if t_tapes.shape[0] > tape_out_size:
        # PyTorch's `tapes[:t_tapes.shape[0]] = t_tapes` would raise here.
        raise ValueError(
            f"concatenated tapes ({t_tapes.shape[0]}) exceed tape_out_size ({tape_out_size})"
        )
    row = jnp.concatenate([c_hid.reshape(-1), t_tapes]).reshape(1, -1)
    return output_forward_batch(row, packed, kp).reshape(1)


if __name__ == "__main__":
    # Small shapes consistent with the module's constructor math:
    #   tape_out_size = batch_size * embd_size * num_mems * 2
    #   in_size       = hidden_size * num_layers + tape_out_size
    batch_size = 2
    embd_size = 4
    num_mems = 2
    hidden_size = 32
    num_layers = 1
    tape_out_size = batch_size * embd_size * num_mems * 2   # 32
    in_size = hidden_size * num_layers + tape_out_size      # 64

    key = jax.random.PRNGKey(0)
    k_hid, k_tapes, k_params, k_batch = jax.random.split(key, 4)

    # Parameters in nn.Linear layout: weight (out_features, in_features), bias (out,)
    ks = jax.random.split(k_params, 6)
    w1 = jax.random.normal(ks[0], (32, in_size), jnp.float32) * 0.1
    b1 = jax.random.normal(ks[1], (32,), jnp.float32) * 0.1
    w2 = jax.random.normal(ks[2], (16, 32), jnp.float32) * 0.1
    b2 = jax.random.normal(ks[3], (16,), jnp.float32) * 0.1
    w3 = jax.random.normal(ks[4], (1, 16), jnp.float32) * 0.1
    b3 = jax.random.normal(ks[5], (1,), jnp.float32) * 0.1
    params = (w1, b1, w2, b2, w3, b3)

    # TODO(synk): in the original module, a bidirectional RNN's c_hid has
    # num_layers*2*batch*hidden elements which is inconsistent with in_size;
    # here c_hid is sized (num_layers, hidden_size) so the Linear shapes match.
    c_hid = jax.random.normal(k_hid, (num_layers, hidden_size), jnp.float32)
    tk = jax.random.split(k_tapes, num_mems)
    mem_tapes = [
        jax.random.normal(tk[i], (batch_size, embd_size, 2), jnp.float32)
        for i in range(num_mems)
    ]

    t_tapes = jnp.concatenate([t.reshape(-1) for t in mem_tapes])
    k_eff = c_hid.size + t_tapes.shape[0]

    # Pack weights ONCE (hoisted out of the per-call path).
    packed, kp = pack_output_params(params, k_eff)

    # --- single-call path (module semantics, returns shape (1,)) ---
    out1 = jax.block_until_ready(output_forward(c_hid, mem_tapes, packed, kp, tape_out_size))

    # --- batched path: T independent timesteps in one pallas_call ---
    T = 256
    rows = jax.random.normal(k_batch, (T, k_eff), jnp.float32)
    outT = jax.block_until_ready(output_forward_batch(rows, packed, kp))

    # pure-JAX reference following the torch code literally (zero-padded tapes, full w1)
    def ref_mlp(x_row):
        h1 = jnp.maximum(x_row @ w1.T + b1, 0.0)
        h2 = jnp.maximum(h1 @ w2.T + b2, 0.0)
        return jax.nn.sigmoid(h2 @ w3.T + b3)

    tapes = jnp.zeros((tape_out_size,), jnp.float32).at[: t_tapes.shape[0]].set(t_tapes)
    ref1 = ref_mlp(jnp.concatenate([c_hid.reshape(-1), tapes]))
    assert out1.shape == (1,)
    assert jnp.allclose(out1, ref1, atol=1e-5), (out1, ref1)

    rows_full = jnp.pad(rows, ((0, 0), (0, in_size - k_eff)))   # zero tail == torch buffer
    refT = jax.vmap(ref_mlp)(rows_full)
    assert outT.shape == (T, 1)
    assert jnp.allclose(outT, refT, atol=1e-5), (outT, refT)

    print("KERNEL_OK")
</pallas_src>

<mosaic_0001>
module attributes {stable_mosaic.version = 11 : i64} {
  func.func @kernel(%arg0: i32, %arg1: memref<72x128xf32, #tpu.memory_space<vmem>>, %arg2: memref<88x72xf32, #tpu.memory_space<vmem>>, %arg3: memref<1x128xf32, #tpu.memory_space<vmem>>) attributes {dimension_semantics = [#tpu.dimension_semantics<parallel>], iteration_bounds = array<i64: 1>, scalar_prefetch = 0 : i64, scratch_operands = 0 : i64, tpu.core_type = #tpu.core_type<tc>, window_params = [{transform_indices = @transform_0, window_bounds = array<i64: 72, 128>}, {pipeline_mode = #tpu.pipeline_mode<synchronous>, transform_indices = @transform_1, window_bounds = array<i64: 88, 72>}, {transform_indices = @transform_2, window_bounds = array<i64: 1, 128>}]} {
    %c0 = arith.constant 0 : index
    %c0_0 = arith.constant 0 : index
    %0 = vector.load %arg1[%c0, %c0_0] : memref<72x128xf32, #tpu.memory_space<vmem>>, vector<72x128xf32>
    %c0_1 = arith.constant 0 : index
    %c0_2 = arith.constant 0 : index
    %1 = vector.load %arg2[%c0_1, %c0_2] : memref<88x72xf32, #tpu.memory_space<vmem>>, vector<40x72xf32>
    %c40 = arith.constant 40 : index
    %c0_3 = arith.constant 0 : index
    %2 = vector.load %arg2[%c40, %c0_3] : memref<88x72xf32, #tpu.memory_space<vmem>>, vector<24x40xf32>
    %c64 = arith.constant 64 : index
    %c0_4 = arith.constant 0 : index
    %3 = vector.load %arg2[%c64, %c0_4] : memref<88x72xf32, #tpu.memory_space<vmem>>, vector<24x1xf32>
    %cst = arith.constant dense<0.000000e+00> : vector<40x128xf32>
    %4 = tpu.matmul %1, %0, %cst {dimension_numbers = #tpu.dot_dimension_numbers<[1], [0], [0], [1], [0, 0, 1, 1], [], []>} : vector<40x72xf32>, vector<72x128xf32>, vector<40x128xf32> -> vector<40x128xf32>
    %cst_5 = arith.constant 0.000000e+00 : f32
    %5 = vector.broadcast %cst_5 : f32 to vector<40x128xf32>
    %6 = arith.maximumf %4, %5 : vector<40x128xf32>
    %cst_6 = arith.constant dense<0.000000e+00> : vector<24x128xf32>
    %7 = tpu.matmul %2, %6, %cst_6 {dimension_numbers = #tpu.dot_dimension_numbers<[1], [0], [0], [1], [0, 0, 1, 1], [], []>} : vector<24x40xf32>, vector<40x128xf32>, vector<24x128xf32> -> vector<24x128xf32>
    %cst_7 = arith.constant 0.000000e+00 : f32
    %8 = vector.broadcast %cst_7 : f32 to vector<24x128xf32>
    %9 = arith.maximumf %7, %8 : vector<24x128xf32>
    %10 = vector.broadcast %3 : vector<24x1xf32> to vector<24x128xf32>
    %11 = arith.mulf %9, %10 : vector<24x128xf32>
    %cst_8 = arith.constant dense<0.000000e+00> : vector<128xf32>
    %12 = vector.multi_reduction <add>, %11, %cst_8 [0] : vector<24x128xf32> to vector<128xf32>
    %13 = vector.shape_cast %12 : vector<128xf32> to vector<1x128xf32>
    %14 = arith.negf %13 : vector<1x128xf32>
    %15 = math.exp %14 : vector<1x128xf32>
    %cst_9 = arith.constant 1.000000e+00 : f32
    %16 = vector.broadcast %cst_9 : f32 to vector<1x128xf32>
    %17 = arith.addf %16, %15 : vector<1x128xf32>
    %18 = arith.divf %16, %17 : vector<1x128xf32>
    %c0_10 = arith.constant 0 : index
    %c0_11 = arith.constant 0 : index
    %19 = vector.load %arg3[%c0_10, %c0_11] : memref<1x128xf32, #tpu.memory_space<vmem>>, vector<1x128xf32>
    tpu.vector_store %arg3[%c0_10, %c0_11], %18 {strides = array<i32>} : memref<1x128xf32, #tpu.memory_space<vmem>>, vector<1x128xf32>,
    return
  }
  func.func @transform_0(%arg0: i32) -> (i32, i32) {
    %c0_i32 = arith.constant 0 : i32
    %c0_i32_0 = arith.constant 0 : i32
    return %c0_i32, %arg0 : i32, i32
  }
  func.func @transform_1(%arg0: i32) -> (i32, i32) {
    %c0_i32 = arith.constant 0 : i32
    %c0_i32_0 = arith.constant 0 : i32
    %c0_i32_1 = arith.constant 0 : i32
    return %c0_i32, %c0_i32_0 : i32, i32
  }
  func.func @transform_2(%arg0: i32) -> (i32, i32) {
    %c0_i32 = arith.constant 0 : i32
    %c0_i32_0 = arith.constant 0 : i32
    return %c0_i32, %arg0 : i32, i32
  }
}

</mosaic_0001>

<bundles_post_ra>
// kernel: tpu_custom_call.1
= control target key start
LH: loop header
LB: loop body
LE: loop exit
PB: predicated region body
PF: predicated region fallthrough
CT: control target
= control target key end

     0   :  { %v419_v3 = vmov 0.0|0.0   ;;  %vm420_vm0 = vmmov 0   ;;  %v421_v6 = vmov 0.0   ;;  %s529_s0 = inlined_call_operand.vmem [shape: f32[72,128], index: 0, kind: input, shape index: {}]   ;;  %s530_s1 = inlined_call_operand.vmem [shape: f32[88,72], index: 1, kind: input, shape index: {}]   ;;  %s531_s2 = inlined_call_operand.hbm [shape: f32[1,128], index: 2, kind: output, shape index: {}]  }
   0x1   :  { %v12_v0 = vld [vmem:[%s529_s0] sm:$0xff]  ;;  %v13_v1 = vld [vmem:[%s529_s0 + $0x8] sm:$0xff]  ;;  %v14_v2 = vld [vmem:[%s529_s0 + $0x10] sm:$0xff]  ;;  %366 = vmatprep.subr.bf16.mxu0 %v419_v3  ;;  %332 = vmatprep.mubr.msk.f32.mxu0 %vm420_vm0, %v421_v6 }
   0x2   :  { %v367_v4 = vpack.c.bf16 %v13_v1, %v12_v0  ;;  %v15_v5 = vld [vmem:[%s529_s0 + $0x18] sm:$0xff]  ;;  %378 = vmatprep.subr.bf16.mxu1 %v419_v3  ;;  %357 = vmatprep.mubr.msk.f32.mxu1 %vm420_vm0, %v421_v6  ;;  %v16_v8 = vld [vmem:[%s529_s0 + $0x20] sm:$0xff]  ;;  %v17_v9 = vld [vmem:[%s529_s0 + $0x28] sm:$0xff] }
   0x3   :  { %v370_v7 = vpack.c.bf16 %v15_v5, %v14_v2 }
   0x4   :  { %368 = vmatpush3.bf16.msra.mxu0 %v367_v4 }
   0x5   :  { %369 = vmatprep.subr.bf16.mxu0 %v419_v3 }
   0x6   :  { %7 = vsyncpa [#allocation3], 0  ;;  %v373_v10 = vpack.c.bf16 %v17_v9, %v16_v8  ;;  %v18_v11 = vld [vmem:[%s529_s0 + $0x30] sm:$0xff]  ;;  %v19_v12 = vld [vmem:[%s529_s0 + $0x38] sm:$0xff]  ;;  %vm32_vm1 = vcmask 588800   ;;  %v422_v22 = vmov 0  }
   0x7   :  { %v376_v13 = vpack.c.bf16 %v19_v12, %v18_v11  ;;  %v20_v14 = vld [vmem:[%s529_s0 + $0x40] sm:$0xff]  ;;  %v22_v16 = vld [vmem:[%s530_s1 + $0x8] sm:$0xff]  ;;  %v23_v17 = vld [vmem:[%s530_s1 + $0x10] sm:$0xff]  ;;  %389 = vset.pattern.permute.xlu0 %v422_v22  ;;  %390 = vset.pattern.permute.xlu1 %v422_v22  ;;  %vm143_vm2 = vcmask 326656  }
   0x8   :  { %371 = vmatpush3.bf16.msra.mxu0 %v370_v7  ;;  %v21_v15 = vld [vmem:[%s530_s1] sm:$0xff]  ;;  %v24_v18 = vld [vmem:[%s530_s1 + $0x18] sm:$0xff]  ;;  %v31_v21 = vld [vmem:[%s530_s1 + $0x50] sm:$0xff] }
   0x9   :  { %372 = vmatprep.subr.bf16.mxu0 %v419_v3  ;;  %v25_v19 = vld [vmem:[%s530_s1 + $0x20] sm:$0xff]  ;;  %248 = vperm.xlu1 %390, %v31_v21   ;;  %v30_v23 = vld [vmem:[%s530_s1 + $0x48] sm:$0xff]  ;;  %v27_v42 = vld [vmem:[%s530_s1 + $0x30] sm:$0xff] }
   0xa   :  { %v29_v20 = vld [vmem:[%s530_s1 + $0x40] sm:$0xff]  ;;  %v26_v41 = vld [vmem:[%s530_s1 + $0x28] sm:$0xff]  ;;  %v28_v43 = vld [vmem:[%s530_s1 + $0x38] sm:$0xff]  ;;  %s423_s1 = smov [#allocation2]  }
   0xb   :  { %238 = vperm.xlu0 %389, %v29_v20   ;;  %s275_s20 = sshll.u32 %s423_s1, 4  ;;  %s276_s20 = int_to_ptr.vmem [resolvable:$true] %s275_s20 }
   0xc   :  { %374 = vmatpush3.bf16.msra.mxu0 %v373_v10  ;;  %s395_s21 = scalar_lea.vmem %s276_s20, 16  ;;  %s399_s22 = scalar_lea.vmem %s276_s20, 32 }
   0xd   :  { %375 = vmatprep.subr.bf16.mxu0 %v419_v3  ;;  %p396_p0 = scmp.ne.s32.totalorder %s276_s20, %s395_s21  ;;  %p400_p1 = scmp.lt.s32.totalorder %s276_s20, %s276_s20 }
   0xe   :  { %p401_p2 = scmp.lt.s32.totalorder %s399_s22, %s395_s21 }
   0xf   :  { %243 = vperm.xlu0 %389, %v30_v23  }
  0x10   :  { %377 = vmatpush3.bf16.msra.mxu0 %v376_v13  ;;  %p402_p3 = por %p401_p2, %p400_p1 }
  0x11   :  { %330 = vmatprep.subr.mxu0 %v421_v6 }
  0x12   :  { %p403_p4 = pnand %p402_p3, %p396_p0 }
  0x14   :  { %331 = vmatpush3.msra.mxu0 %v20_v14 }
  0x15   :  { %333 = vmatmul.mubr.msk.f32.vlgmr.msra.gmra.mrb[0].mxu0 %vm32_vm1, %v21_v15 }
  0x16   :  { %335 = vmatprep.mubr.msk.f32.mxu0 %vm420_vm0, %v421_v6 }
  0x19   :  { %336 = vmatmul.mubr.msk.f32.gmra.mrb[2].mxu0 %vm32_vm1, %v22_v16 }
  0x1a   :  { %338 = vmatprep.mubr.msk.f32.mxu0 %vm420_vm0, %v421_v6 }
  0x1d   :  { %339 = vmatmul.mubr.msk.f32.gmra.mrb[4].mxu0 %vm32_vm1, %v23_v17 }
  0x1e   :  { %341 = vmatprep.mubr.msk.f32.mxu0 %vm420_vm0, %v421_v6 }
  0x21   :  { %342 = vmatmul.mubr.msk.f32.gmra.mrb[6].mxu0 %vm32_vm1, %v24_v18 }
  0x22   :  { %344 = vmatprep.mubr.msk.f32.mxu0 %vm420_vm0, %v421_v6 }
  0x25   :  { %345 = vmatmul.mubr.msk.f32.gmra.mrb[8].mxu0 %vm32_vm1, %v25_v19 }
  0x88   :  { %v249_v55 = vpop.permute.xlu1 %248 }
  0x8a   :  { %v239_v44 = vpop.permute.xlu0 %238 }
  0x8e   :  { %v244_v51 = vpop.permute.xlu0 %243 }
  0xe8   :  { %v114_v24 = vpop.f32.mrb[0].mxu0 }
  0xe9   :  { %v334_v25 = vpop.f32.mrb[1].mxu0  ;;  %v138_v27 = vmax.f32 %v114_v24, 0.0 }
  0xec   :  { %v119_v26 = vpop.f32.mrb[2].mxu0 }
  0xed   :  { %v139_v28 = vmax.f32 %v119_v26, 0.0  ;;  %v337_v29 = vpop.f32.mrb[3].mxu0 }
  0xef   :  { %v379_v30 = vpack.c.bf16 %v139_v28, %v138_v27 }
  0xf0   :  { %v124_v31 = vpop.f32.mrb[4].mxu0 }
  0xf1   :  { %v340_v32 = vpop.f32.mrb[5].mxu0  ;;  %380 = vmatpush3.bf16.msra.mxu1 %v379_v30  ;;  %v140_v34 = vmax.f32 %v124_v31, 0.0 }
  0xf2   :  { %381 = vmatprep.subr.bf16.mxu1 %v419_v3 }
  0xf4   :  { %v129_v33 = vpop.f32.mrb[6].mxu0 }
  0xf5   :  { %v141_v35 = vmax.f32 %v129_v33, 0.0  ;;  %v343_v36 = vpop.f32.mrb[7].mxu0 }
  0xf7   :  { %v382_v37 = vpack.c.bf16 %v141_v35, %v140_v34 }
  0xf8   :  { %v134_v38 = vpop.f32.mrb[8].mxu0 }
  0xf9   :  { %v142_v39 = vmax.f32 %v134_v38, 0.0  ;;  %383 = vmatpush3.bf16.msra.mxu1 %v382_v37  ;;  %v346_v40 = vpop.f32.mrb[9].mxu0 }
  0xfa   :  { %355 = vmatprep.subr.mxu1 %v421_v6 }
  0xfd   :  { %356 = vmatpush3.msra.mxu1 %v142_v39 }
  0xfe   :  { %358 = vmatmul.mubr.msk.f32.vlgmr.msra.gmra.mrb[0].mxu1 %vm143_vm2, %v26_v41 }
  0xff   :  { %360 = vmatprep.mubr.msk.f32.mxu1 %vm420_vm0, %v421_v6 }
 0x102   :  { %361 = vmatmul.mubr.msk.f32.gmra.mrb[2].mxu1 %vm143_vm2, %v27_v42 }
 0x103   :  { %363 = vmatprep.mubr.msk.f32.mxu1 %vm420_vm0, %v421_v6 }
 0x106   :  { %364 = vmatmul.mubr.msk.f32.gmra.mrb[4].mxu1 %vm143_vm2, %v28_v43 }
 0x1d1   :  { %v219_v45 = vpop.f32.mrb[0].mxu1 }
 0x1d2   :  { %v359_v46 = vpop.f32.mrb[1].mxu1  ;;  %v233_v47 = vmax.f32 %v219_v45, 0.0 }
 0x1d4   :  { %v251_v52 = vmul.f32 %v239_v44, %v233_v47 }
 0x1d5   :  { %v224_v48 = vpop.f32.mrb[2].mxu1 }
 0x1d6   :  { %v234_v49 = vmax.f32 %v224_v48, 0.0  ;;  %v362_v50 = vpop.f32.mrb[3].mxu1 }
 0x1d8   :  { %v252_v53 = vmul.f32 %v244_v51, %v234_v49 }
 0x1d9   :  { %v229_v54 = vpop.f32.mrb[4].mxu1 }
 0x1da   :  { %v235_v56 = vmax.f32 %v229_v54, 0.0  ;;  %v365_v57 = vpop.f32.mrb[5].mxu1  ;;  %v254_v58 = vadd.f32 %v252_v53, %v251_v52 }
 0x1dc   :  { %v253_v59 = vmul.f32 %v249_v55, %v235_v56 }
 0x1de   :  { %v255_v60 = vadd.f32 %v254_v58, %v253_v59 }
 0x1e0   :  { %v256_v61 = vrot.slane %v255_v60, 4 }
 0x1e2   :  { %v257_v62 = vadd.f32 %v256_v61, %v255_v60 }
 0x1e4   :  { %v258_v63 = vrot.slane %v257_v62, 2 }
 0x1e6   :  { %v259_v0 = vadd.f32 %v258_v63, %v257_v62 }
 0x1e8   :  { %v260_v1 = vrot.slane %v259_v0, 1 }
 0x1ea   :  { %v261_v2 = vadd.f32 %v260_v1, %v259_v0 }
 0x1ec   :  { %v291_v3 = vmul.f32 -1.442695, %v261_v2 }
 0x1ee   :  { %391 = vpow2.f32 %v291_v3 }
 0x1f8   :  { %v392_v4 = vpop.eup %391 }
 0x1f9   :  { %v265_v5 = vadd.f32 1.0, %v392_v4 }
 0x1fb   :  { %393 = vrcp.f32 %v265_v5 }
 0x205   :  { %v394_v6 = vpop.eup %393 }
 0x206   :  { %268 = vst [vmem:[#allocation2] sm:$0x1] %v394_v6 }
 0x207   :  { %406 = shalt.err (!%p403_p4)
}
 0x208   :  { %s407_s25 = scalar_lea.hbm %s531_s2, 16 }
 0x209   :  { %p408_p5 = scmp.ne.s32.totalorder %s531_s2, %s407_s25  ;;  %p411_p6 = scmp.lt.u32.totalorder %s407_s25, %s531_s2 }
 0x20b   :  { %p413_p7 = pnand %p411_p6, %p408_p5 }
 0x20d   :  { %416 = shalt.err (!%p413_p7)
}
 0x20e   :  { %278 = dma.vmem_to_hbm [thread:$0]  %s276_s20, 16, %s531_s2, [#allocation3]  }
 0x20f   :  { %417 = dma.done.wait [#allocation3], 16  }
 0x210   :  { %418 = vsyncadd [#allocation3], 4294967280 }
 0x211   :  { %282 = vsyncpa [#allocation3], 1 }

</bundles_post_ra>
